<compile_context>
chip_gen: v7x
topology: tpu7x:2x2x1
jax: 0.10.0
libtpu: 0.0.40
codegen_flags: <defaults>
</compile_context>

<pallas_src>
import jax
import jax.numpy as jnp
import numpy as np
from jax.experimental import pallas as pl
from jax.experimental.pallas import tpu as pltpu

# ----------------------------- static shapes --------------------------------
B = 2                  # batch
L = 16                 # per-input sequence length (each xi is (B, L))
H = 128                # LSTM hidden size
NIN = 5                # number of stacked inputs

C0, K0, P0 = 2, 1, 1   # Conv1d(1, 2, kernel=1, pad=1)
C1, K1, P1 = 4, 3, 1   # Conv1d(2, 4, kernel=3, pad=1)
C2, K2, P2 = 8, 9, 1   # Conv1d(4, 8, kernel=9, pad=1)

L0 = L + 2 * P0 - K0 + 1     # 18
L1 = L0 + 2 * P1 - K1 + 1    # 18
L2 = L1 + 2 * P2 - K2 + 1    # 12
L0P = L0 + 2 * P1            # 20: conv0 output stored WITH conv1's zero halo
L1P = L1 + 2 * P2            # 20: conv1 output stored WITH conv2's zero halo
FEAT = C2 * L2               # 96: per-input conv feature width
SLAB = 128                   # lane-dense padded per-input feature width
LSTM_DIM = NIN * FEAT        # 480 (true feature dim; padded to NIN*SLAB = 640)


# ------------------------------ fused kernel ---------------------------------
def _fused_kernel(x1_ref, x2_ref, x3_ref, x4_ref, x5_ref,
                  w0t_ref, b0v_ref, w1t_ref, b1v_ref, w2t_ref, b2v_ref,
                  wih_ref, gbias_ref, wfc_ref, bfc_ref,
                  out_ref, xcat_ref):
    # Pack the 5 inputs on sublanes: rows [inp*B, (inp+1)*B) hold input `inp`.
    for inp, xr in enumerate((x1_ref, x2_ref, x3_ref, x4_ref, x5_ref)):
        xcat_ref[inp * B:(inp + 1) * B, :] = xr[...]
    x = xcat_ref[...]                                             # (10, 16)

    # Conv chain as block-Toeplitz matmuls (MXU).  Halo lanes are produced as
    # exact zeros (all-zero weight columns + zero bias + relu), so no per-layer
    # padding / concatenation and no per-tap lane shifts are needed.
    a0 = jnp.maximum(jnp.dot(x, w0t_ref[...],
                             preferred_element_type=jnp.float32)
                     + b0v_ref[...], 0.0)                          # (10, 40)
    a1 = jnp.maximum(jnp.dot(a0, w1t_ref[...],
                             preferred_element_type=jnp.float32)
                     + b1v_ref[...], 0.0)                          # (10, 80)
    a2 = jnp.maximum(jnp.dot(a1, w2t_ref[...],
                             preferred_element_type=jnp.float32)
                     + b2v_ref[...], 0.0)                          # (10, 128), lanes 96..127 == 0

    # LSTM gates: accumulate per-input-slab contributions with pre-packed,
    # lane-aligned bf16 W_ih blocks (f32 accumulation on the MXU).
    acc = jnp.zeros((B, 4 * H), jnp.float32)
    for inp in range(NIN):
        slab = a2[inp * B:(inp + 1) * B, :].astype(jnp.bfloat16)   # (B, 128)
        acc = acc + jnp.dot(slab, wih_ref[inp],
                            preferred_element_type=jnp.float32)    # (B, 512)
    gates = acc + gbias_ref[...]

    # PyTorch gate order i, f, g, o; c0 == 0 so f is irrelevant.
    i_g = jax.nn.sigmoid(gates[:, 0:H])
    g_g = jnp.tanh(gates[:, 2 * H:3 * H])
    o_g = jax.nn.sigmoid(gates[:, 3 * H:4 * H])
    h = o_g * jnp.tanh(i_g * g_g)          # == lstm_out[:, -1, :]; Dropout = identity

    # Final Linear(H -> 1) as VPU broadcast-multiply + lane (XLU) reduction.
    out_ref[...] = jnp.sum(h * wfc_ref[...], axis=-1, keepdims=True) + bfc_ref[...]


def _forward_impl(packed, x1, x2, x3, x4, x5):
    vmem = pl.BlockSpec(memory_space=pltpu.MemorySpace.VMEM)
    return pl.pallas_call(
        _fused_kernel,
        out_shape=jax.ShapeDtypeStruct((B, 1), jnp.float32),
        in_specs=[vmem] * 15,
        out_specs=vmem,
        scratch_shapes=[pltpu.VMEM((NIN * B, L), jnp.float32)],
    )(x1, x2, x3, x4, x5,
      packed["w0t"], packed["b0v"], packed["w1t"], packed["b1v"],
      packed["w2t"], packed["b2v"], packed["wih_p"], packed["gbias"],
      packed["wfc_row"], packed["bfc"])


wheatgp_forward = jax.jit(_forward_impl)


# --------------------------- parameter packing -------------------------------
def init_params(key):
    """Canonical f32 parameters (same distribution as the previous version)."""
    ks = jax.random.split(key, 11)
    cs, ls = 0.5, 0.05
    return {
        "w0": jax.random.normal(ks[0], (C0, 1, K0), jnp.float32) * cs,
        "b0": jax.random.normal(ks[1], (C0,), jnp.float32) * cs,
        "w1": jax.random.normal(ks[2], (C1, C0, K1), jnp.float32) * cs,
        "b1": jax.random.normal(ks[3], (C1,), jnp.float32) * cs,
        "w2": jax.random.normal(ks[4], (C2, C1, K2), jnp.float32) * cs,
        "b2": jax.random.normal(ks[5], (C2,), jnp.float32) * cs,
        "wih": jax.random.normal(ks[6], (4 * H, LSTM_DIM), jnp.float32) * ls,
        "b_ih": jax.random.normal(ks[7], (4 * H,), jnp.float32) * ls,
        "b_hh": jax.random.normal(ks[8], (4 * H,), jnp.float32) * ls,
        "wfc": jax.random.normal(ks[9], (1, H), jnp.float32) * ls,
        "bfc": jax.random.normal(ks[10], (1,), jnp.float32) * ls,
    }


def pack_params(p):
    """One-time (outside jit) packing: block-Toeplitz conv matrices, per-lane
    bias rows, padded/transposed bf16 W_ih, fused gate bias, FC row."""
    w0 = np.asarray(p["w0"], np.float32)
    b0 = np.asarray(p["b0"], np.float32)
    w1 = np.asarray(p["w1"], np.float32)
    b1 = np.asarray(p["b1"], np.float32)
    w2 = np.asarray(p["w2"], np.float32)
    b2 = np.asarray(p["b2"], np.float32)

    # conv0: x (., L) -> a0 (., C0*L0P); channel co lives in lanes
    # [co*L0P+1, co*L0P+L0], lanes co*L0P+{0, L0P-1} are conv1's zero halo.
    W0 = np.zeros((L, C0 * L0P), np.float32)
    B0 = np.zeros((1, C0 * L0P), np.float32)
    for co in range(C0):
        for j in range(L):                       # output position s = j + 1
            W0[j, co * L0P + P1 + (j + 1)] = w0[co, 0, 0]
        B0[0, co * L0P + P1: co * L0P + P1 + L0] = b0[co]

    # conv1: a0 (., C0*L0P) -> a1 (., C1*L1P); halo lanes for conv2 stay zero.
    W1 = np.zeros((C0 * L0P, C1 * L1P), np.float32)
    B1 = np.zeros((1, C1 * L1P), np.float32)
    for co in range(C1):
        for ci in range(C0):
            for t in range(L1):
                for k in range(K1):
                    W1[ci * L0P + t + k, co * L1P + P2 + t] += w1[co, ci, k]
        B1[0, co * L1P + P2: co * L1P + P2 + L1] = b1[co]

    # conv2: a1 (., C1*L1P) -> a2 (., SLAB); channel co in lanes [co*L2,(co+1)*L2),
    # lanes FEAT..SLAB-1 are zero padding (lane-dense 128-wide per-input slab).
    W2 = np.zeros((C1 * L1P, SLAB), np.float32)
    B2 = np.zeros((1, SLAB), np.float32)
    for co in range(C2):
        for ci in range(C1):
            for t in range(L2):
                for k in range(K2):
                    W2[ci * L1P + t + k, co * L2 + t] += w2[co, ci, k]
        B2[0, co * L2:(co + 1) * L2] = b2[co]

    # W_ih: (4H, 480) -> transpose, split per input, pad 96 -> 128 rows, bf16.
    wih_t = np.asarray(p["wih"], np.float32).T             # (480, 512)
    wih_p = np.zeros((NIN, SLAB, 4 * H), np.float32)
    for i in range(NIN):
        wih_p[i, :FEAT, :] = wih_t[i * FEAT:(i + 1) * FEAT, :]

    gbias = (np.asarray(p["b_ih"], np.float32)
             + np.asarray(p["b_hh"], np.float32)).reshape(1, 4 * H)

    return {
        "w0t": jnp.asarray(W0), "b0v": jnp.asarray(B0),
        "w1t": jnp.asarray(W1), "b1v": jnp.asarray(B1),
        "w2t": jnp.asarray(W2), "b2v": jnp.asarray(B2),
        "wih_p": jnp.asarray(wih_p, dtype=jnp.bfloat16),
        "gbias": jnp.asarray(gbias),
        "wfc_row": jnp.asarray(np.asarray(p["wfc"], np.float32).reshape(1, H)),
        "bfc": jnp.asarray(np.asarray(p["bfc"], np.float32).reshape(1, 1)),
    }


# ------------------------------ pure-JAX reference ---------------------------
def _conv1d_ref(x, w, b, pad):
    K = w.shape[2]
    Lout = x.shape[2] + 2 * pad - K + 1
    xp = jnp.pad(x, ((0, 0), (0, 0), (pad, pad)))
    cols = jnp.stack([xp[:, :, k:k + Lout] for k in range(K)], axis=-1)
    return jnp.einsum("ock,bclk->bol", w, cols) + b[None, :, None]


def forward_ref(p, xs):
    flats = []
    for x in xs:
        h = x[:, None, :]
        h = jax.nn.relu(_conv1d_ref(h, p["w0"], p["b0"], 1))
        h = jax.nn.relu(_conv1d_ref(h, p["w1"], p["b1"], 1))
        h = jax.nn.relu(_conv1d_ref(h, p["w2"], p["b2"], 1))
        flats.append(h.reshape(x.shape[0], -1))
    feat = jnp.concatenate(flats, axis=1)
    gates = feat @ p["wih"].T + p["b_ih"] + p["b_hh"]
    i_g = jax.nn.sigmoid(gates[:, 0:H])
    g_g = jnp.tanh(gates[:, 2 * H:3 * H])
    o_g = jax.nn.sigmoid(gates[:, 3 * H:4 * H])
    h = o_g * jnp.tanh(i_g * g_g)
    return h @ p["wfc"].T + p["bfc"]


# ----------------------------------- main ------------------------------------
if __name__ == "__main__":
    key = jax.random.PRNGKey(0)
    pkey, *xkeys = jax.random.split(key, 6)
    params = init_params(pkey)
    packed = pack_params(params)          # one-time host-side packing
    xs = [jax.random.normal(k, (B, L), jnp.float32) for k in xkeys]

    out = wheatgp_forward(packed, *xs)
    out = jax.block_until_ready(out)

    # Re-verified after the bf16 W_ih change (review's correctness concern):
    # comparison is against the full-f32 reference; the slightly wider 5e-3
    # tolerance covers the bf16 quantization of W_ih and the bf16 gate matmul.
    ref = forward_ref(params, xs)
    np.testing.assert_allclose(np.asarray(out), np.asarray(ref),
                               rtol=5e-3, atol=5e-3)
    assert out.shape == (B, 1)
    print("KERNEL_OK")
</pallas_src>

<mosaic_0001>
module attributes {stable_mosaic.version = 11 : i64} {
  func.func @_fused_kernel(%arg0: memref<2x16xf32, #tpu.memory_space<vmem>>, %arg1: memref<2x16xf32, #tpu.memory_space<vmem>>, %arg2: memref<2x16xf32, #tpu.memory_space<vmem>>, %arg3: memref<2x16xf32, #tpu.memory_space<vmem>>, %arg4: memref<2x16xf32, #tpu.memory_space<vmem>>, %arg5: memref<16x40xf32, #tpu.memory_space<vmem>>, %arg6: memref<1x40xf32, #tpu.memory_space<vmem>>, %arg7: memref<40x80xf32, #tpu.memory_space<vmem>>, %arg8: memref<1x80xf32, #tpu.memory_space<vmem>>, %arg9: memref<80x128xf32, #tpu.memory_space<vmem>>, %arg10: memref<1x128xf32, #tpu.memory_space<vmem>>, %arg11: memref<5x128x512xbf16, #tpu.memory_space<vmem>>, %arg12: memref<1x512xf32, #tpu.memory_space<vmem>>, %arg13: memref<1x128xf32, #tpu.memory_space<vmem>>, %arg14: memref<1x1xf32, #tpu.memory_space<vmem>>, %arg15: memref<2x1xf32, #tpu.memory_space<vmem>>, %arg16: memref<10x16xf32, #tpu.memory_space<vmem>>) attributes {dimension_semantics = [], scalar_prefetch = 0 : i64, scratch_operands = 1 : i64, tpu.core_type = #tpu.core_type<tc>} {
    %c0 = arith.constant 0 : index
    %c0_0 = arith.constant 0 : index
    %0 = vector.load %arg0[%c0, %c0_0] : memref<2x16xf32, #tpu.memory_space<vmem>>, vector<2x16xf32>
    %c0_1 = arith.constant 0 : index
    %c0_2 = arith.constant 0 : index
    %1 = vector.load %arg16[%c0_1, %c0_2] : memref<10x16xf32, #tpu.memory_space<vmem>>, vector<2x16xf32>
    tpu.vector_store %arg16[%c0_1, %c0_2], %0 {strides = array<i32>} : memref<10x16xf32, #tpu.memory_space<vmem>>, vector<2x16xf32>,
    %c0_3 = arith.constant 0 : index
    %c0_4 = arith.constant 0 : index
    %2 = vector.load %arg1[%c0_3, %c0_4] : memref<2x16xf32, #tpu.memory_space<vmem>>, vector<2x16xf32>
    %c2 = arith.constant 2 : index
    %c0_5 = arith.constant 0 : index
    %3 = vector.load %arg16[%c2, %c0_5] : memref<10x16xf32, #tpu.memory_space<vmem>>, vector<2x16xf32>
    tpu.vector_store %arg16[%c2, %c0_5], %2 {strides = array<i32>} : memref<10x16xf32, #tpu.memory_space<vmem>>, vector<2x16xf32>,
    %c0_6 = arith.constant 0 : index
    %c0_7 = arith.constant 0 : index
    %4 = vector.load %arg2[%c0_6, %c0_7] : memref<2x16xf32, #tpu.memory_space<vmem>>, vector<2x16xf32>
    %c4 = arith.constant 4 : index
    %c0_8 = arith.constant 0 : index
    %5 = vector.load %arg16[%c4, %c0_8] : memref<10x16xf32, #tpu.memory_space<vmem>>, vector<2x16xf32>
    tpu.vector_store %arg16[%c4, %c0_8], %4 {strides = array<i32>} : memref<10x16xf32, #tpu.memory_space<vmem>>, vector<2x16xf32>,
    %c0_9 = arith.constant 0 : index
    %c0_10 = arith.constant 0 : index
    %6 = vector.load %arg3[%c0_9, %c0_10] : memref<2x16xf32, #tpu.memory_space<vmem>>, vector<2x16xf32>
    %c6 = arith.constant 6 : index
    %c0_11 = arith.constant 0 : index
    %7 = vector.load %arg16[%c6, %c0_11] : memref<10x16xf32, #tpu.memory_space<vmem>>, vector<2x16xf32>
    tpu.vector_store %arg16[%c6, %c0_11], %6 {strides = array<i32>} : memref<10x16xf32, #tpu.memory_space<vmem>>, vector<2x16xf32>,
    %c0_12 = arith.constant 0 : index
    %c0_13 = arith.constant 0 : index
    %8 = vector.load %arg4[%c0_12, %c0_13] : memref<2x16xf32, #tpu.memory_space<vmem>>, vector<2x16xf32>
    %c8 = arith.constant 8 : index
    %c0_14 = arith.constant 0 : index
    %9 = vector.load %arg16[%c8, %c0_14] : memref<10x16xf32, #tpu.memory_space<vmem>>, vector<2x16xf32>
    tpu.vector_store %arg16[%c8, %c0_14], %8 {strides = array<i32>} : memref<10x16xf32, #tpu.memory_space<vmem>>, vector<2x16xf32>,
    %c0_15 = arith.constant 0 : index
    %c0_16 = arith.constant 0 : index
    %10 = vector.load %arg16[%c0_15, %c0_16] : memref<10x16xf32, #tpu.memory_space<vmem>>, vector<10x16xf32>
    %c0_17 = arith.constant 0 : index
    %c0_18 = arith.constant 0 : index
    %11 = vector.load %arg5[%c0_17, %c0_18] : memref<16x40xf32, #tpu.memory_space<vmem>>, vector<16x40xf32>
    %cst = arith.constant dense<0.000000e+00> : vector<10x40xf32>
    %12 = tpu.matmul %10, %11, %cst {dimension_numbers = #tpu.dot_dimension_numbers<[1], [0], [0], [1], [0, 0, 1, 1], [], []>} : vector<10x16xf32>, vector<16x40xf32>, vector<10x40xf32> -> vector<10x40xf32>
    %c0_19 = arith.constant 0 : index
    %c0_20 = arith.constant 0 : index
    %13 = vector.load %arg6[%c0_19, %c0_20] : memref<1x40xf32, #tpu.memory_space<vmem>>, vector<1x40xf32>
    %14 = vector.broadcast %13 : vector<1x40xf32> to vector<10x40xf32>
    %15 = arith.addf %12, %14 : vector<10x40xf32>
    %cst_21 = arith.constant 0.000000e+00 : f32
    %16 = vector.broadcast %cst_21 : f32 to vector<10x40xf32>
    %17 = arith.maximumf %15, %16 : vector<10x40xf32>
    %c0_22 = arith.constant 0 : index
    %c0_23 = arith.constant 0 : index
    %18 = vector.load %arg7[%c0_22, %c0_23] : memref<40x80xf32, #tpu.memory_space<vmem>>, vector<40x80xf32>
    %cst_24 = arith.constant dense<0.000000e+00> : vector<10x80xf32>
    %19 = tpu.matmul %17, %18, %cst_24 {dimension_numbers = #tpu.dot_dimension_numbers<[1], [0], [0], [1], [0, 0, 1, 1], [], []>} : vector<10x40xf32>, vector<40x80xf32>, vector<10x80xf32> -> vector<10x80xf32>
    %c0_25 = arith.constant 0 : index
    %c0_26 = arith.constant 0 : index
    %20 = vector.load %arg8[%c0_25, %c0_26] : memref<1x80xf32, #tpu.memory_space<vmem>>, vector<1x80xf32>
    %21 = vector.broadcast %20 : vector<1x80xf32> to vector<10x80xf32>
    %22 = arith.addf %19, %21 : vector<10x80xf32>
    %cst_27 = arith.constant 0.000000e+00 : f32
    %23 = vector.broadcast %cst_27 : f32 to vector<10x80xf32>
    %24 = arith.maximumf %22, %23 : vector<10x80xf32>
    %c0_28 = arith.constant 0 : index
    %c0_29 = arith.constant 0 : index
    %25 = vector.load %arg9[%c0_28, %c0_29] : memref<80x128xf32, #tpu.memory_space<vmem>>, vector<80x128xf32>
    %cst_30 = arith.constant dense<0.000000e+00> : vector<10x128xf32>
    %26 = tpu.matmul %24, %25, %cst_30 {dimension_numbers = #tpu.dot_dimension_numbers<[1], [0], [0], [1], [0, 0, 1, 1], [], []>} : vector<10x80xf32>, vector<80x128xf32>, vector<10x128xf32> -> vector<10x128xf32>
    %c0_31 = arith.constant 0 : index
    %c0_32 = arith.constant 0 : index
    %27 = vector.load %arg10[%c0_31, %c0_32] : memref<1x128xf32, #tpu.memory_space<vmem>>, vector<1x128xf32>
    %28 = vector.broadcast %27 : vector<1x128xf32> to vector<10x128xf32>
    %29 = arith.addf %26, %28 : vector<10x128xf32>
    %cst_33 = arith.constant 0.000000e+00 : f32
    %30 = vector.broadcast %cst_33 : f32 to vector<10x128xf32>
    %31 = arith.maximumf %29, %30 : vector<10x128xf32>
    %cst_34 = arith.constant 0.000000e+00 : f32
    %32 = vector.broadcast %cst_34 : f32 to vector<2x512xf32>
    %33 = vector.extract_strided_slice %31 {offsets = [0, 0], sizes = [2, 128], strides = [1, 1]} : vector<10x128xf32> to vector<2x128xf32>
    %34 = arith.truncf %33 : vector<2x128xf32> to vector<2x128xbf16>
    %c0_35 = arith.constant 0 : index
    %c0_36 = arith.constant 0 : index
    %c0_37 = arith.constant 0 : index
    %35 = vector.load %arg11[%c0_35, %c0_36, %c0_37] : memref<5x128x512xbf16, #tpu.memory_space<vmem>>, vector<1x128x512xbf16>
    %36 = vector.shape_cast %35 : vector<1x128x512xbf16> to vector<128x512xbf16>
    %cst_38 = arith.constant dense<0.000000e+00> : vector<2x512xf32>
    %37 = tpu.matmul %34, %36, %cst_38 {dimension_numbers = #tpu.dot_dimension_numbers<[1], [0], [0], [1], [0, 0, 1, 1], [], []>} : vector<2x128xbf16>, vector<128x512xbf16>, vector<2x512xf32> -> vector<2x512xf32>
    %38 = arith.addf %32, %37 : vector<2x512xf32>
    %39 = vector.extract_strided_slice %31 {offsets = [2, 0], sizes = [2, 128], strides = [1, 1]} : vector<10x128xf32> to vector<2x128xf32>
    %40 = arith.truncf %39 : vector<2x128xf32> to vector<2x128xbf16>
    %c1 = arith.constant 1 : index
    %c0_39 = arith.constant 0 : index
    %c0_40 = arith.constant 0 : index
    %41 = vector.load %arg11[%c1, %c0_39, %c0_40] : memref<5x128x512xbf16, #tpu.memory_space<vmem>>, vector<1x128x512xbf16>
    %42 = vector.shape_cast %41 : vector<1x128x512xbf16> to vector<128x512xbf16>
    %cst_41 = arith.constant dense<0.000000e+00> : vector<2x512xf32>
    %43 = tpu.matmul %40, %42, %cst_41 {dimension_numbers = #tpu.dot_dimension_numbers<[1], [0], [0], [1], [0, 0, 1, 1], [], []>} : vector<2x128xbf16>, vector<128x512xbf16>, vector<2x512xf32> -> vector<2x512xf32>
    %44 = arith.addf %38, %43 : vector<2x512xf32>
    %45 = vector.extract_strided_slice %31 {offsets = [4, 0], sizes = [2, 128], strides = [1, 1]} : vector<10x128xf32> to vector<2x128xf32>
    %46 = arith.truncf %45 : vector<2x128xf32> to vector<2x128xbf16>
    %c2_42 = arith.constant 2 : index
    %c0_43 = arith.constant 0 : index
    %c0_44 = arith.constant 0 : index
    %47 = vector.load %arg11[%c2_42, %c0_43, %c0_44] : memref<5x128x512xbf16, #tpu.memory_space<vmem>>, vector<1x128x512xbf16>
    %48 = vector.shape_cast %47 : vector<1x128x512xbf16> to vector<128x512xbf16>
    %cst_45 = arith.constant dense<0.000000e+00> : vector<2x512xf32>
    %49 = tpu.matmul %46, %48, %cst_45 {dimension_numbers = #tpu.dot_dimension_numbers<[1], [0], [0], [1], [0, 0, 1, 1], [], []>} : vector<2x128xbf16>, vector<128x512xbf16>, vector<2x512xf32> -> vector<2x512xf32>
    %50 = arith.addf %44, %49 : vector<2x512xf32>
    %51 = vector.extract_strided_slice %31 {offsets = [6, 0], sizes = [2, 128], strides = [1, 1]} : vector<10x128xf32> to vector<2x128xf32>
    %52 = arith.truncf %51 : vector<2x128xf32> to vector<2x128xbf16>
    %c3 = arith.constant 3 : index
    %c0_46 = arith.constant 0 : index
    %c0_47 = arith.constant 0 : index
    %53 = vector.load %arg11[%c3, %c0_46, %c0_47] : memref<5x128x512xbf16, #tpu.memory_space<vmem>>, vector<1x128x512xbf16>
    %54 = vector.shape_cast %53 : vector<1x128x512xbf16> to vector<128x512xbf16>
    %cst_48 = arith.constant dense<0.000000e+00> : vector<2x512xf32>
    %55 = tpu.matmul %52, %54, %cst_48 {dimension_numbers = #tpu.dot_dimension_numbers<[1], [0], [0], [1], [0, 0, 1, 1], [], []>} : vector<2x128xbf16>, vector<128x512xbf16>, vector<2x512xf32> -> vector<2x512xf32>
    %56 = arith.addf %50, %55 : vector<2x512xf32>
    %57 = vector.extract_strided_slice %31 {offsets = [8, 0], sizes = [2, 128], strides = [1, 1]} : vector<10x128xf32> to vector<2x128xf32>
    %58 = arith.truncf %57 : vector<2x128xf32> to vector<2x128xbf16>
    %c4_49 = arith.constant 4 : index
    %c0_50 = arith.constant 0 : index
    %c0_51 = arith.constant 0 : index
    %59 = vector.load %arg11[%c4_49, %c0_50, %c0_51] : memref<5x128x512xbf16, #tpu.memory_space<vmem>>, vector<1x128x512xbf16>
    %60 = vector.shape_cast %59 : vector<1x128x512xbf16> to vector<128x512xbf16>
    %cst_52 = arith.constant dense<0.000000e+00> : vector<2x512xf32>
    %61 = tpu.matmul %58, %60, %cst_52 {dimension_numbers = #tpu.dot_dimension_numbers<[1], [0], [0], [1], [0, 0, 1, 1], [], []>} : vector<2x128xbf16>, vector<128x512xbf16>, vector<2x512xf32> -> vector<2x512xf32>
    %62 = arith.addf %56, %61 : vector<2x512xf32>
    %c0_53 = arith.constant 0 : index
    %c0_54 = arith.constant 0 : index
    %63 = vector.load %arg12[%c0_53, %c0_54] : memref<1x512xf32, #tpu.memory_space<vmem>>, vector<1x512xf32>
    %64 = vector.broadcast %63 : vector<1x512xf32> to vector<2x512xf32>
    %65 = arith.addf %62, %64 : vector<2x512xf32>
    %66 = vector.extract_strided_slice %65 {offsets = [0, 0], sizes = [2, 128], strides = [1, 1]} : vector<2x512xf32> to vector<2x128xf32>
    %67 = arith.negf %66 : vector<2x128xf32>
    %68 = math.exp %67 : vector<2x128xf32>
    %cst_55 = arith.constant 1.000000e+00 : f32
    %69 = vector.broadcast %cst_55 : f32 to vector<2x128xf32>
    %70 = arith.addf %69, %68 : vector<2x128xf32>
    %71 = arith.divf %69, %70 : vector<2x128xf32>
    %72 = vector.extract_strided_slice %65 {offsets = [0, 256], sizes = [2, 128], strides = [1, 1]} : vector<2x512xf32> to vector<2x128xf32>
    %73 = math.tanh %72 : vector<2x128xf32>
    %74 = vector.extract_strided_slice %65 {offsets = [0, 384], sizes = [2, 128], strides = [1, 1]} : vector<2x512xf32> to vector<2x128xf32>
    %75 = arith.negf %74 : vector<2x128xf32>
    %76 = math.exp %75 : vector<2x128xf32>
    %cst_56 = arith.constant 1.000000e+00 : f32
    %77 = vector.broadcast %cst_56 : f32 to vector<2x128xf32>
    %78 = arith.addf %77, %76 : vector<2x128xf32>
    %79 = arith.divf %77, %78 : vector<2x128xf32>
    %80 = arith.mulf %71, %73 : vector<2x128xf32>
    %81 = math.tanh %80 : vector<2x128xf32>
    %82 = arith.mulf %79, %81 : vector<2x128xf32>
    %c0_57 = arith.constant 0 : index
    %c0_58 = arith.constant 0 : index
    %83 = vector.load %arg13[%c0_57, %c0_58] : memref<1x128xf32, #tpu.memory_space<vmem>>, vector<1x128xf32>
    %84 = vector.broadcast %83 : vector<1x128xf32> to vector<2x128xf32>
    %85 = arith.mulf %82, %84 : vector<2x128xf32>
    %cst_59 = arith.constant dense<0.000000e+00> : vector<2xf32>
    %86 = vector.multi_reduction <add>, %85, %cst_59 [1] : vector<2x128xf32> to vector<2xf32>
    %87 = vector.shape_cast %86 : vector<2xf32> to vector<2x1xf32>
    %c0_60 = arith.constant 0 : index
    %c0_61 = arith.constant 0 : index
    %88 = vector.load %arg14[%c0_60, %c0_61] : memref<1x1xf32, #tpu.memory_space<vmem>>, vector<1x1xf32>
    %89 = vector.broadcast %88 : vector<1x1xf32> to vector<2x1xf32>
    %90 = arith.addf %87, %89 : vector<2x1xf32>
    %c0_62 = arith.constant 0 : index
    %c0_63 = arith.constant 0 : index
    %91 = vector.load %arg15[%c0_62, %c0_63] : memref<2x1xf32, #tpu.memory_space<vmem>>, vector<2x1xf32>
    tpu.vector_store %arg15[%c0_62, %c0_63], %90 {strides = array<i32>} : memref<2x1xf32, #tpu.memory_space<vmem>>, vector<2x1xf32>,
    return
  }
}

</mosaic_0001>

<bundles_post_ra>
// kernel: _forward_impl.1
= control target key start
LH: loop header
LB: loop body
LE: loop exit
PB: predicated region body
PF: predicated region fallthrough
CT: control target
= control target key end

     0   :  { %s2824_s0 = inlined_call_operand.vmem [shape: f32[2,16], index: 0, kind: input, shape index: {}]   ;;  %s2825_s1 = inlined_call_operand.vmem [shape: f32[2,16], index: 1, kind: input, shape index: {}]   ;;  %s2826_s2 = inlined_call_operand.vmem [shape: f32[2,16], index: 2, kind: input, shape index: {}]   ;;  %s2827_s3 = inlined_call_operand.vmem [shape: f32[2,16], index: 3, kind: input, shape index: {}]   ;;  %s2828_s4 = inlined_call_operand.vmem [shape: f32[2,16], index: 4, kind: input, shape index: {}]   ;;  %s2829_s5 = inlined_call_operand.vmem [shape: f32[16,40], index: 5, kind: input, shape index: {}]   ;;  %s2830_s6 = inlined_call_operand.hbm [shape: f32[1,40], index: 6, kind: input, shape index: {}]   ;;  %s2831_s7 = inlined_call_operand.hbm [shape: f32[40,80], index: 7, kind: input, shape index: {}]   ;;  %s2832_s8 = inlined_call_operand.hbm [shape: f32[1,80], index: 8, kind: input, shape index: {}]   ;;  %s2833_s9 = inlined_call_operand.hbm [shape: f32[80,128], index: 9, kind: input, shape index: {}]   ;;  %s2834_s10 = inlined_call_operand.hbm [shape: f32[1,128], index: 10, kind: input, shape index: {}]   ;;  %s2835_s11 = inlined_call_operand.hbm [shape: bf16[5,128,512], index: 11, kind: input, shape index: {}]   ;;  %s2836_s12 = inlined_call_operand.hbm [shape: f32[1,512], index: 12, kind: input, shape index: {}]   ;;  %s2837_s13 = inlined_call_operand.vmem [shape: f32[1,128], index: 13, kind: input, shape index: {}]   ;;  %s2838_s14 = inlined_call_operand.<no memory space> [shape: f32[1,1], index: 14, kind: input, shape index: {}]   ;;  %s2839_s15 = inlined_call_operand.vmem [shape: f32[2,1], index: 15, kind: output, shape index: {}]  }
   0x1   :  { %v20_v0 = vstv %s2838_s14 }
   0x2   :  { %21 = vst [vmem:[#allocation3] sm:$0x1] %v20_v0 }
   0x3   :  { %22 = vsyncpa [#allocation5], 0 }
   0x4   :  { %23 = vsyncpa [#allocation7], 0 }
   0x5   :  { %24 = vsyncpa [#allocation10], 0 }
   0x6   :  { %25 = vsyncpa [#allocation13], 0  ;;  %s2593_s20 = smov [#allocation6]   ;;  %s2431_s24 = scalar_lea.hbm %s2831_s7, 640 }
   0x7   :  { %s53_s21 = sshll.u32 %s2593_s20, 4  ;;  %p2432_p0 = scmp.ne.s32.totalorder %s2831_s7, %s2431_s24  ;;  %s54_s21 = int_to_ptr.vmem [resolvable:$true] %s53_s21 }
   0x8   :  { %p2435_p1 = scmp.lt.u32.totalorder %s2431_s24, %s2831_s7 }
   0xa   :  { %p2437_p2 = pnand %p2435_p1, %p2432_p0 }
   0xc   :  { %2440 = shalt.err (!%p2437_p2)
}
   0xd   :  { %s2441_s14 = scalar_lea.vmem %s54_s21, 640  ;;  %p2446_p4 = scmp.lt.s32.totalorder %s54_s21, %s54_s21 }
   0xe   :  { %p2442_p3 = scmp.ne.s32.totalorder %s54_s21, %s2441_s14  ;;  %p2447_p5 = scmp.lt.s32.totalorder %s2441_s14, %s2441_s14 }
  0x10   :  { %p2448_p6 = por %p2447_p5, %p2446_p4 }
  0x12   :  { %p2449_p7 = pnand %p2448_p6, %p2442_p3 }
  0x14   :  { %2452 = shalt.err (!%p2449_p7)
}
  0x15   :  { %s2594_s29 = smov 128   ;;  %s2595_s30 = smov 8  }
  0x16   :  { %59 = dma.hbm_to_vmem [thread:$0]  %s2831_s7, 640, %s54_s21, [#allocation7], %s2594_s29, %s2594_s29, %s2595_s30  }
  0x17   :  { %s2596_s18 = smov [#allocation9]   ;;  %s2597_s20 = smov [#allocation12]  }
  0x18   :  { %s75_s19 = sshll.u32 %s2596_s18, 4  ;;  %s97_s22 = sshll.u32 %s2597_s20, 4  ;;  %s76_s19 = int_to_ptr.vmem [resolvable:$true] %s75_s19  ;;  %s98_s22 = int_to_ptr.vmem [resolvable:$true] %s97_s22 }
  0x19   :  { %s2453_s25 = scalar_lea.hbm %s2833_s9, 1280 }
  0x1a   :  { %p2454_p8 = scmp.ne.s32.totalorder %s2833_s9, %s2453_s25  ;;  %p2457_p9 = scmp.lt.u32.totalorder %s2453_s25, %s2833_s9 }
  0x1c   :  { %p2459_p10 = pnand %p2457_p9, %p2454_p8 }
  0x1e   :  { %2462 = shalt.err (!%p2459_p10)
}
  0x1f   :  { %s2463_s7 = scalar_lea.vmem %s76_s19, 1280  ;;  %p2468_p12 = scmp.lt.s32.totalorder %s76_s19, %s76_s19 }
  0x20   :  { %p2464_p11 = scmp.ne.s32.totalorder %s76_s19, %s2463_s7  ;;  %p2469_p13 = scmp.lt.s32.totalorder %s2463_s7, %s2463_s7 }
  0x22   :  { %p2470_p0 = por %p2469_p13, %p2468_p12 }
  0x24   :  { %p2471_p1 = pnand %p2470_p0, %p2464_p11 }
  0x26   :  { %2474 = shalt.err (!%p2471_p1)
}
  0x27   :  { %81 = dma.hbm_to_vmem [thread:$0]  %s2833_s9, 1280, %s76_s19, [#allocation10], %s2594_s29, %s2594_s29, %s2595_s30  }
  0x28   :  { %s2475_s20 = scalar_lea.hbm %s2835_s11, 20480 }
  0x29   :  { %p2476_p2 = scmp.ne.s32.totalorder %s2835_s11, %s2475_s20  ;;  %p2479_p3 = scmp.lt.u32.totalorder %s2475_s20, %s2835_s11 }
  0x2b   :  { %p2481_p4 = pnand %p2479_p3, %p2476_p2 }
  0x2d   :  { %2484 = shalt.err (!%p2481_p4)
}
  0x2e   :  { %s2485_s27 = scalar_lea.vmem %s98_s22, 20480  ;;  %p2490_p6 = scmp.lt.s32.totalorder %s98_s22, %s98_s22 }
  0x2f   :  { %p2486_p5 = scmp.ne.s32.totalorder %s98_s22, %s2485_s27  ;;  %p2491_p7 = scmp.lt.s32.totalorder %s2485_s27, %s2485_s27 }
  0x31   :  { %p2492_p8 = por %p2491_p7, %p2490_p6 }
  0x33   :  { %p2493_p9 = pnand %p2492_p8, %p2486_p5 }
  0x35   :  { %2496 = shalt.err (!%p2493_p9)
}
  0x36   :  { %s2598_s9 = smov 256   ;;  %s2599_s29 = smov 16  }
  0x37   :  { %103 = dma.hbm_to_vmem [thread:$0]  %s2835_s11, 20480, %s98_s22, [#allocation13], %s2598_s9, %s2598_s9, %s2599_s29  }
  0x38   :  { %s2600_s28 = smov [#allocation4]   ;;  %s2601_s7 = smov [#allocation8]  }
  0x39   :  { %s44_s14 = sshll.u32 %s2600_s28, 4  ;;  %s66_s21 = sshll.u32 %s2601_s7, 4  ;;  %s45_s14 = int_to_ptr.vmem [resolvable:$true] %s44_s14  ;;  %s67_s21 = int_to_ptr.vmem [resolvable:$true] %s66_s21 }
  0x3a   :  { %s2497_s18 = scalar_lea.hbm %s2830_s6, 16 }
  0x3b   :  { %p2498_p10 = scmp.ne.s32.totalorder %s2830_s6, %s2497_s18  ;;  %p2501_p11 = scmp.lt.u32.totalorder %s2497_s18, %s2830_s6 }
  0x3d   :  { %p2503_p12 = pnand %p2501_p11, %p2498_p10 }
  0x3f   :  { %2506 = shalt.err (!%p2503_p12)
}
  0x40   :  { %s2507_s11 = scalar_lea.vmem %s45_s14, 16  ;;  %s2511_s22 = scalar_lea.vmem %s45_s14, 32 }
  0x41   :  { %p2508_p13 = scmp.ne.s32.totalorder %s45_s14, %s2507_s11  ;;  %p2512_p0 = scmp.lt.s32.totalorder %s45_s14, %s45_s14 }
  0x42   :  { %p2513_p1 = scmp.lt.s32.totalorder %s2511_s22, %s2507_s11 }
  0x44   :  { %p2514_p2 = por %p2513_p1, %p2512_p0 }
  0x46   :  { %p2515_p3 = pnand %p2514_p2, %p2508_p13 }
  0x48   :  { %2518 = shalt.err (!%p2515_p3)
}
  0x49   :  { %47 = dma.hbm_to_vmem [thread:$0]  %s2830_s6, 16, %s45_s14, [#allocation5]  }
  0x4a   :  { %s2519_s30 = scalar_lea.hbm %s2832_s8, 16 }
  0x4b   :  { %p2520_p4 = scmp.ne.s32.totalorder %s2832_s8, %s2519_s30  ;;  %p2523_p5 = scmp.lt.u32.totalorder %s2519_s30, %s2832_s8 }
  0x4d   :  { %p2525_p6 = pnand %p2523_p5, %p2520_p4 }
  0x4f   :  { %2528 = shalt.err (!%p2525_p6)
}
  0x50   :  { %s2529_s17 = scalar_lea.vmem %s67_s21, 16  ;;  %s2533_s18 = scalar_lea.vmem %s67_s21, 32 }
  0x51   :  { %p2530_p7 = scmp.ne.s32.totalorder %s67_s21, %s2529_s17  ;;  %p2534_p8 = scmp.lt.s32.totalorder %s67_s21, %s67_s21 }
  0x52   :  { %p2535_p9 = scmp.lt.s32.totalorder %s2533_s18, %s2529_s17 }
  0x54   :  { %p2536_p10 = por %p2535_p9, %p2534_p8 }
  0x56   :  { %p2537_p11 = pnand %p2536_p10, %p2530_p7 }
  0x58   :  { %2540 = shalt.err (!%p2537_p11)
}
  0x59   :  { %69 = dma.hbm_to_vmem [thread:$0]  %s2832_s8, 16, %s67_s21, [#allocation7]  }
  0x5a   :  { %s2602_s20 = smov [#allocation11]   ;;  %s2603_s24 = smov [#allocation14]  }
  0x5b   :  { %s88_s23 = sshll.u32 %s2602_s20, 4  ;;  %s110_s25 = sshll.u32 %s2603_s24, 4  ;;  %s89_s23 = int_to_ptr.vmem [resolvable:$true] %s88_s23  ;;  %s111_s25 = int_to_ptr.vmem [resolvable:$true] %s110_s25 }
  0x5c   :  { %s2541_s26 = scalar_lea.hbm %s2834_s10, 16 }
  0x5d   :  { %p2542_p12 = scmp.ne.s32.totalorder %s2834_s10, %s2541_s26  ;;  %p2545_p13 = scmp.lt.u32.totalorder %s2541_s26, %s2834_s10 }
  0x5f   :  { %p2547_p0 = pnand %p2545_p13, %p2542_p12 }
  0x61   :  { %2550 = shalt.err (!%p2547_p0)
}
  0x62   :  { %s2551_s8 = scalar_lea.vmem %s89_s23, 16  ;;  %s2555_s21 = scalar_lea.vmem %s89_s23, 32 }
  0x63   :  { %p2552_p1 = scmp.ne.s32.totalorder %s89_s23, %s2551_s8  ;;  %p2556_p2 = scmp.lt.s32.totalorder %s89_s23, %s89_s23 }
  0x64   :  { %p2557_p3 = scmp.lt.s32.totalorder %s2555_s21, %s2551_s8 }
  0x66   :  { %p2558_p4 = por %p2557_p3, %p2556_p2 }
  0x68   :  { %p2559_p5 = pnand %p2558_p4, %p2552_p1 }
  0x6a   :  { %2562 = shalt.err (!%p2559_p5)
}
  0x6b   :  { %91 = dma.hbm_to_vmem [thread:$0]  %s2834_s10, 16, %s89_s23, [#allocation10]  }
  0x6c   :  { %s2563_s17 = scalar_lea.hbm %s2836_s12, 64 }
  0x6d   :  { %p2564_p6 = scmp.ne.s32.totalorder %s2836_s12, %s2563_s17  ;;  %p2567_p7 = scmp.lt.u32.totalorder %s2563_s17, %s2836_s12 }
  0x6f   :  { %p2569_p8 = pnand %p2567_p7, %p2564_p6 }
  0x71   :  { %2572 = shalt.err (!%p2569_p8)
}
  0x72   :  { %s2573_s24 = scalar_lea.vmem %s111_s25, 64  ;;  %p2578_p10 = scmp.lt.s32.totalorder %s111_s25, %s111_s25 }
  0x73   :  { %p2574_p9 = scmp.ne.s32.totalorder %s111_s25, %s2573_s24  ;;  %p2579_p11 = scmp.lt.s32.totalorder %s2573_s24, %s2573_s24 }
  0x75   :  { %p2580_p12 = por %p2579_p11, %p2578_p10 }
  0x77   :  { %p2581_p13 = pnand %p2580_p12, %p2574_p9 }
  0x79   :  { %2584 = shalt.err (!%p2581_p13)
}
  0x7a   :  { %113 = dma.hbm_to_vmem [thread:$0]  %s2836_s12, 64, %s111_s25, [#allocation13]  }
  0x7b   :  { %2585 = dma.done.wait [#allocation5], 16  }
  0x7c   :  { %2586 = vsyncadd [#allocation5], 4294967280 }
  0x7d   :  { %2587 = dma.done.wait [#allocation7], 656  }
  0x7e   :  { %2588 = vsyncadd [#allocation7], 4294966640 }
  0x7f   :  { %2589 = dma.done.wait [#allocation10], 1296  }
  0x80   :  { %2590 = vsyncadd [#allocation10], 4294966000 }
  0x81   :  { %2591 = dma.done.wait [#allocation13], 20544  }
  0x82   :  { %2592 = vsyncadd [#allocation13], 4294946752  ;;  %vm141_vm0 = vcmask 123904   ;;  %v153_v1 = vld [vmem:[%s2829_s5] sm:$0xff]  ;;  %v154_v2 = vld [vmem:[%s2829_s5 + $0x8] sm:$0xff]  ;;  %vm162_vm1 = vcmask 130048  }
  0x83   :  { %v140_v3 = vld [vmem:[%s2824_s0] sm:$0x3]  ;;  %v2135_v4 = vpack.c.bf16 %v154_v2, %v153_v1  ;;  %v246_v9 = vld [vmem:[#allocation6] sm:$0xff]  ;;  %v248_v14 = vld [vmem:[#allocation6 + $0x10] sm:$0xff]  ;;  %vm258_vm2 = vcmask 326656   ;;  %vm359_vm3 = vcmask 654336  }
  0x84   :  { %142 = vst.msk [vmem:[#allocation2] sm:$0x3] %vm141_vm0, %v140_v3  ;;  %v143_v5 = vld [vmem:[%s2825_s1] sm:$0x3]  ;;  %v249_v15 = vld [vmem:[#allocation6 + $0x18] sm:$0xff]  ;;  %v250_v17 = vld [vmem:[#allocation6 + $0x20] sm:$0xff] }
  0x85   :  { %v145_v6 = vld [vmem:[%s2826_s2] sm:$0x3]  ;;  %144 = vst.msk [vmem:[#allocation2 + $0x2] sm:$0x3] %vm141_vm0, %v143_v5  ;;  %2136 = vmatprep.subr.bf16.mxu1 %v2135_v4  ;;  %v2143_v16 = vpack.c.bf16 %v249_v15, %v248_v14  ;;  %v343_v19 = vld [vmem:[#allocation9 + $0x8] sm:$0xff]  ;;  %v344_v20 = vld [vmem:[#allocation9 + $0x10] sm:$0xff] }
  0x86   :  { %v147_v7 = vld [vmem:[%s2827_s3] sm:$0x3]  ;;  %146 = vst.msk [vmem:[#allocation2 + $0x4] sm:$0x3] %vm141_vm0, %v145_v6  ;;  %2138 = vmatpush3.bf16.msra.mxu1 %v2135_v4  ;;  %v345_v22 = vld [vmem:[#allocation9 + $0x18] sm:$0xff]  ;;  %v347_v25 = vld [vmem:[#allocation9 + $0x28] sm:$0xff] }
  0x87   :  { %148 = vst.msk [vmem:[#allocation2 + $0x6] sm:$0x3] %vm141_vm0, %v147_v7  ;;  %v149_v8 = vld [vmem:[%s2828_s4] sm:$0x3]  ;;  %v2151_v23 = vpack.c.bf16 %v345_v22, %v344_v20  ;;  %v348_v27 = vld [vmem:[#allocation9 + $0x30] sm:$0xff]  ;;  %v349_v28 = vld [vmem:[#allocation9 + $0x38] sm:$0xff] }
  0x88   :  { %v247_v10 = vld [vmem:[#allocation6 + $0x8] sm:$0xff]  ;;  %150 = vst.msk [vmem:[#allocation2 + $0x8] sm:$0x3] %vm141_vm0, %v149_v8  ;;  %v2159_v29 = vpack.c.bf16 %v349_v28, %v348_v27  ;;  %v1896_v30 = vld [vmem:[#allocation4] ss:$0 sm:$0xff]  ;;  %v351_v38 = vld [vmem:[#allocation9 + $0x48] sm:$0xff] }
  0x89   :  { %v2139_v11 = vpack.c.bf16 %v247_v10, %v246_v9  ;;  %v342_v18 = vld [vmem:[#allocation9] sm:$0xff]  ;;  %v1899_v53 = vld [vmem:[#allocation8] ss:$0 sm:$0xff]  ;;  %v2182_v59 = vld [vmem:[#allocation12 + $0x108] ss:$16 sps:$4 sm:$0xff]   ;;  %vm1874_vm4 = vcmask 1041408  }
  0x8a   :  { %v2147_v21 = vpack.c.bf16 %v343_v19, %v342_v18  ;;  %v346_v24 = vld [vmem:[#allocation9 + $0x20] sm:$0xff]  ;;  %v2188_v62 = vld [vmem:[#allocation12 + $0x128] ss:$16 sps:$4 sm:$0xff]   ;;  %v1902_v18 = vld [vmem:[#allocation11] ss:$0 sm:$0xff]  ;;  %vm1886_vm5 = vcmask 1024  }
  0x8b   :  { %2140 = vmatprep.subr.bf16.mxu1 %v2139_v11  ;;  %v2155_v26 = vpack.c.bf16 %v347_v25, %v346_v24  ;;  %v350_v37 = vld [vmem:[#allocation9 + $0x40] sm:$0xff]  ;;  %v2194_v0 = vld [vmem:[#allocation12 + $0x148] ss:$16 sps:$4 sm:$0xff]  }
  0x8c   :  { %2148 = vmatprep.subr.bf16.mxu0 %v2147_v21  ;;  %v2163_v39 = vpack.c.bf16 %v351_v38, %v350_v37  ;;  %v2179_v40 = vld [vmem:[#allocation12 + $0x100] ss:$16 sps:$4 sm:$0xff]   ;;  %v2181_v41 = vld [vmem:[#allocation12 + $0x104] ss:$16 sps:$4 sm:$0xff]   ;;  %v2184_v42 = vld [vmem:[#allocation12 + $0x10c] ss:$16 sps:$4 sm:$0xff]  }
  0x8d   :  { %2150 = vmatpush3.bf16.msra.mxu0 %v2147_v21  ;;  %v2187_v43 = vld [vmem:[#allocation12 + $0x124] ss:$16 sps:$4 sm:$0xff]   ;;  %v2185_v44 = vld [vmem:[#allocation12 + $0x120] ss:$16 sps:$4 sm:$0xff]   ;;  %v2190_v61 = vld [vmem:[#allocation12 + $0x12c] ss:$16 sps:$4 sm:$0xff]  }
  0x8e   :  { %v151_v12 = vld [vmem:[#allocation2] sm:$0xff]  ;;  %2152 = vmatprep.subr.bf16.mxu0 %v2151_v23  ;;  %v2196_v63 = vld [vmem:[#allocation12 + $0x14c] ss:$16 sps:$4 sm:$0xff]  }
  0x8f   :  { %2096 = vmatprep.mubr.msk.f32.mxu1 %vm162_vm1, %v151_v12  ;;  %v152_v13 = vld [vmem:[#allocation2 + $0x8] sm:$0x3]  ;;  %v2193_v45 = vld [vmem:[#allocation12 + $0x144] ss:$16 sps:$4 sm:$0xff]   ;;  %v2191_v46 = vld [vmem:[#allocation12 + $0x140] ss:$16 sps:$4 sm:$0xff]  }
  0x90   :  { %2097 = vmatmul.mubr.msk.f32.vlgmr.msra.gmra.mrb[0].mxu1 %vm162_vm1, %v152_v13  ;;  %v2199_v47 = vld [vmem:[#allocation12 + $0x164] ss:$16 sps:$4 sm:$0xff]   ;;  %v2197_v48 = vld [vmem:[#allocation12 + $0x160] ss:$16 sps:$4 sm:$0xff]   ;;  %v2202_v1 = vld [vmem:[#allocation12 + $0x16c] ss:$16 sps:$4 sm:$0xff]  }
  0x91   :  { %2142 = vmatpush3.bf16.msra.mxu1 %v2139_v11  ;;  %2154 = vmatpush3.bf16.msra.mxu0 %v2151_v23  ;;  %v2205_v49 = vld [vmem:[#allocation12 + $0x184] ss:$16 sps:$4 sm:$0xff]   ;;  %v2203_v50 = vld [vmem:[#allocation12 + $0x180] ss:$16 sps:$4 sm:$0xff]   ;;  %v2200_v2 = vld [vmem:[#allocation12 + $0x168] ss:$16 sps:$4 sm:$0xff]  }
  0x92   :  { %2144 = vmatprep.subr.bf16.mxu1 %v2143_v16  ;;  %2156 = vmatprep.subr.bf16.mxu0 %v2155_v26  ;;  %v2211_v51 = vld [vmem:[#allocation12 + $0x1a4] ss:$16 sps:$4 sm:$0xff]   ;;  %v2209_v52 = vld [vmem:[#allocation12 + $0x1a0] ss:$16 sps:$4 sm:$0xff]   ;;  %v2208_v3 = vld [vmem:[#allocation12 + $0x18c] ss:$16 sps:$4 sm:$0xff]  }
  0x93   :  { %v2206_v4 = vld [vmem:[#allocation12 + $0x188] ss:$16 sps:$4 sm:$0xff]   ;;  %v2214_v5 = vld [vmem:[#allocation12 + $0x1ac] ss:$16 sps:$4 sm:$0xff]   ;;  %v2217_v7 = vld [vmem:[#allocation12 + $0x1c4] ss:$16 sps:$4 sm:$0xff]  }
  0x94   :  { %v2212_v6 = vld [vmem:[#allocation12 + $0x1a8] ss:$16 sps:$4 sm:$0xff]   ;;  %v2220_v8 = vld [vmem:[#allocation12 + $0x1cc] ss:$16 sps:$4 sm:$0xff]   ;;  %v2215_v9 = vld [vmem:[#allocation12 + $0x1c0] ss:$16 sps:$4 sm:$0xff]  }
  0x95   :  { %2146 = vmatpush3.bf16.msra.mxu1 %v2143_v16  ;;  %2158 = vmatpush3.bf16.msra.mxu0 %v2155_v26  ;;  %v2218_v10 = vld [vmem:[#allocation12 + $0x1c8] ss:$16 sps:$4 sm:$0xff]   ;;  %v2223_v11 = vld [vmem:[#allocation12 + $0x1e4] ss:$16 sps:$4 sm:$0xff]   ;;  %v2226_v12 = vld [vmem:[#allocation12 + $0x1ec] ss:$16 sps:$4 sm:$0xff]  }
  0x96   :  { %2107 = vmatprep.subr.mxu1 %v250_v17  ;;  %2160 = vmatprep.subr.bf16.mxu0 %v2159_v29  ;;  %v2221_v13 = vld [vmem:[#allocation12 + $0x1e0] ss:$16 sps:$4 sm:$0xff]   ;;  %v2224_v14 = vld [vmem:[#allocation12 + $0x1e8] ss:$16 sps:$4 sm:$0xff]   ;;  %v2229_v15 = vld [vmem:[#allocation12 + $0x4] ss:$16 sps:$4 sm:$0xff]  }
  0x97   :  { %v2604_v16 = vmov 0   ;;  %v2227_v25 = vld [vmem:[#allocation12] ss:$16 sps:$4 sm:$0xff]   ;;  %v2230_v26 = vld [vmem:[#allocation12 + $0x8] ss:$16 sps:$4 sm:$0xff]  }
  0x98   :  { %v2235_v28 = vld [vmem:[#allocation12 + $0x24] ss:$16 sps:$4 sm:$0xff]   ;;  %v2250_v37 = vld [vmem:[#allocation12 + $0x6c] ss:$16 sps:$4 sm:$0xff]   ;;  %v2245_v38 = vld [vmem:[#allocation12 + $0x60] ss:$16 sps:$4 sm:$0xff]  }
  0x99   :  { %2108 = vmatpush3.msra.mxu1 %v250_v17  ;;  %2162 = vmatpush3.bf16.msra.mxu0 %v2159_v29  ;;  %v2232_v17 = vld [vmem:[#allocation12 + $0xc] ss:$16 sps:$4 sm:$0xff]  }
  0x9a   :  { %2164 = vmatprep.subr.bf16.mxu0 %v2163_v39  ;;  %672 = vmatprep.subr.bf16.mxu1 %v2181_v41  ;;  %v2238_v29 = vld [vmem:[#allocation12 + $0x2c] ss:$16 sps:$4 sm:$0xff]  }
  0x9b   :  { %v2256_v41 = vld [vmem:[#allocation12 + $0x8c] ss:$16 sps:$4 sm:$0xff]  }
  0x9d   :  { %2166 = vmatpush3.bf16.msra.mxu0 %v2163_v39  ;;  %v2248_v39 = vld [vmem:[#allocation12 + $0x68] ss:$16 sps:$4 sm:$0xff]  }
  0x9e   :  { %712 = vmatprep.subr.bf16.mxu0 %v2184_v42  ;;  %v2251_v42 = vld [vmem:[#allocation12 + $0x80] ss:$16 sps:$4 sm:$0xff]  }
 0x163   :  { %v2098_v31 = vpop.f32.mrb[0].mxu1 }
 0x164   :  { %v241_v32 = vadd.f32 %v2098_v31, %v1896_v30  ;;  %v235_v33 = vpop.f32.mrb[1].mxu1  ;;  %v2236_v31 = vld [vmem:[#allocation12 + $0x28] ss:$16 sps:$4 sm:$0xff]  }
 0x165   :  { %v236_v34 = vadd.f32 %v1896_v30, %v235_v33  ;;  %v2233_v30 = vld [vmem:[#allocation12 + $0x20] ss:$16 sps:$4 sm:$0xff]   ;;  %v2244_v33 = vld [vmem:[#allocation12 + $0x4c] ss:$16 sps:$4 sm:$0xff]  }
 0x166   :  { %v245_v36 = vmax.f32 %v241_v32, 0.0  ;;  %v2241_v32 = vld [vmem:[#allocation12 + $0x44] ss:$16 sps:$4 sm:$0xff]  }
 0x167   :  { %v244_v35 = vmax.f32 %v236_v34, 0.0  ;;  %v2239_v34 = vld [vmem:[#allocation12 + $0x40] ss:$16 sps:$4 sm:$0xff]  }
 0x169   :  { %2109 = vmatprep.mubr.msk.f32.mxu1 %vm258_vm2, %v244_v35  ;;  %v2242_v35 = vld [vmem:[#allocation12 + $0x48] ss:$16 sps:$4 sm:$0xff]  }
 0x16a   :  { %2110 = vmatmul.mubr.msk.f32.vlgmr.msra.gmra.mrb[2].mxu1 %vm258_vm2, %v245_v36  ;;  %v2247_v36 = vld [vmem:[#allocation12 + $0x64] ss:$16 sps:$4 sm:$0xff]  }
 0x16b   :  { %673 = vmatpush1.bf16.msra.mxu1 %v2179_v40  ;;  %704 = vmatprep.mubr.bf16.mxu1 %v2604_v16  ;;  %v2253_v40 = vld [vmem:[#allocation12 + $0x84] ss:$16 sps:$4 sm:$0xff]  }
 0x16c   :  { %674 = vmatprep.subr.bf16.mxu1 %v2187_v43  ;;  %v2254_v43 = vld [vmem:[#allocation12 + $0x88] ss:$16 sps:$4 sm:$0xff]  }
 0x16f   :  { %675 = vmatpush1.bf16.msra.mxu1 %v2185_v44  ;;  %v2259_v44 = vld [vmem:[#allocation12 + $0xa4] ss:$16 sps:$4 sm:$0xff]  }
 0x170   :  { %676 = vmatprep.subr.bf16.mxu1 %v2193_v45  ;;  %v2262_v45 = vld [vmem:[#allocation12 + $0xac] ss:$16 sps:$4 sm:$0xff]  }
 0x173   :  { %677 = vmatpush1.bf16.msra.mxu1 %v2191_v46  ;;  %v2257_v46 = vld [vmem:[#allocation12 + $0xa0] ss:$16 sps:$4 sm:$0xff]  }
 0x174   :  { %678 = vmatprep.subr.bf16.mxu1 %v2199_v47  ;;  %v2260_v47 = vld [vmem:[#allocation12 + $0xa8] ss:$16 sps:$4 sm:$0xff]  }
 0x177   :  { %679 = vmatpush1.bf16.msra.mxu1 %v2197_v48  ;;  %v2265_v48 = vld [vmem:[#allocation12 + $0xc4] ss:$16 sps:$4 sm:$0xff]  }
 0x178   :  { %680 = vmatprep.subr.bf16.mxu1 %v2205_v49  ;;  %v2268_v49 = vld [vmem:[#allocation12 + $0xcc] ss:$16 sps:$4 sm:$0xff]  }
 0x17b   :  { %681 = vmatpush1.bf16.msra.mxu1 %v2203_v50  ;;  %v2263_v50 = vld [vmem:[#allocation12 + $0xc0] ss:$16 sps:$4 sm:$0xff]  }
 0x17c   :  { %682 = vmatprep.subr.bf16.mxu1 %v2211_v51  ;;  %v2266_v51 = vld [vmem:[#allocation12 + $0xc8] ss:$16 sps:$4 sm:$0xff]  }
 0x17f   :  { %683 = vmatpush1.bf16.msra.mxu1 %v2209_v52  ;;  %v2271_v52 = vld [vmem:[#allocation12 + $0xe4] ss:$16 sps:$4 sm:$0xff]  }
 0x180   :  { %684 = vmatprep.subr.bf16.mxu1 %v2217_v7  ;;  %v2296_v7 = vld [vmem:[#allocation12 + $0x268] ss:$16 sps:$4 sm:$0xff]  }
 0x183   :  { %685 = vmatpush1.bf16.msra.mxu1 %v2215_v9  ;;  %v2304_v9 = vld [vmem:[#allocation12 + $0x28c] ss:$16 sps:$4 sm:$0xff]  }
 0x184   :  { %686 = vmatprep.subr.bf16.mxu1 %v2223_v11  ;;  %v2302_v11 = vld [vmem:[#allocation12 + $0x288] ss:$16 sps:$4 sm:$0xff]  }
 0x187   :  { %687 = vmatpush1.bf16.msra.mxu1 %v2221_v13  ;;  %v2310_v13 = vld [vmem:[#allocation12 + $0x2ac] ss:$16 sps:$4 sm:$0xff]  }
 0x188   :  { %913 = vmatprep.subr.bf16.mxu1 %v2229_v15  ;;  %v2308_v15 = vld [vmem:[#allocation12 + $0x2a8] ss:$16 sps:$4 sm:$0xff]  }
 0x23d   :  { %v2111_v54 = vpop.f32.mrb[2].mxu1 }
 0x23e   :  { %v337_v55 = vadd.f32 %v2111_v54, %v1899_v53  ;;  %v331_v56 = vpop.f32.mrb[3].mxu1  ;;  %v2269_v54 = vld [vmem:[#allocation12 + $0xe0] ss:$16 sps:$4 sm:$0xff]  }
 0x23f   :  { %v332_v57 = vadd.f32 %v1899_v53, %v331_v56  ;;  %v2274_v53 = vld [vmem:[#allocation12 + $0xec] ss:$16 sps:$4 sm:$0xff]   ;;  %v2277_v56 = vld [vmem:[#allocation12 + $0x204] ss:$16 sps:$4 sm:$0xff]  }
 0x240   :  { %v341_v60 = vmax.f32 %v337_v55, 0.0  ;;  %v2272_v55 = vld [vmem:[#allocation12 + $0xe8] ss:$16 sps:$4 sm:$0xff]  }
 0x241   :  { %v340_v58 = vmax.f32 %v332_v57, 0.0  ;;  %v2280_v57 = vld [vmem:[#allocation12 + $0x20c] ss:$16 sps:$4 sm:$0xff]  }
 0x243   :  { %2132 = vmatprep.mubr.msk.f32.mxu0 %vm359_vm3, %v340_v58  ;;  %v2275_v58 = vld [vmem:[#allocation12 + $0x200] ss:$16 sps:$4 sm:$0xff]  }
 0x244   :  { %2133 = vmatmul.mubr.msk.f32.vlgmr.msra.gmra.mrb[0].mxu0 %vm359_vm3, %v341_v60  ;;  %v2283_v60 = vld [vmem:[#allocation12 + $0x224] ss:$16 sps:$4 sm:$0xff]  }
 0x245   :  { %713 = vmatpush1.bf16.msra.mxu0 %v2182_v59  ;;  %744 = vmatprep.mubr.bf16.mxu0 %v2604_v16  ;;  %v2278_v59 = vld [vmem:[#allocation12 + $0x208] ss:$16 sps:$4 sm:$0xff]  }
 0x246   :  { %714 = vmatprep.subr.bf16.mxu0 %v2190_v61  ;;  %v2286_v61 = vld [vmem:[#allocation12 + $0x22c] ss:$16 sps:$4 sm:$0xff]  }
 0x249   :  { %715 = vmatpush1.bf16.msra.mxu0 %v2188_v62  ;;  %v2281_v62 = vld [vmem:[#allocation12 + $0x220] ss:$16 sps:$4 sm:$0xff]  }
 0x24a   :  { %716 = vmatprep.subr.bf16.mxu0 %v2196_v63  ;;  %v2284_v63 = vld [vmem:[#allocation12 + $0x228] ss:$16 sps:$4 sm:$0xff]  }
 0x24d   :  { %717 = vmatpush1.bf16.msra.mxu0 %v2194_v0  ;;  %v2289_v0 = vld [vmem:[#allocation12 + $0x244] ss:$16 sps:$4 sm:$0xff]  }
 0x24e   :  { %718 = vmatprep.subr.bf16.mxu0 %v2202_v1  ;;  %v2292_v1 = vld [vmem:[#allocation12 + $0x24c] ss:$16 sps:$4 sm:$0xff]  }
 0x251   :  { %719 = vmatpush1.bf16.msra.mxu0 %v2200_v2  ;;  %v2287_v2 = vld [vmem:[#allocation12 + $0x240] ss:$16 sps:$4 sm:$0xff]  }
 0x252   :  { %720 = vmatprep.subr.bf16.mxu0 %v2208_v3  ;;  %v2290_v3 = vld [vmem:[#allocation12 + $0x248] ss:$16 sps:$4 sm:$0xff]  }
 0x255   :  { %721 = vmatpush1.bf16.msra.mxu0 %v2206_v4  ;;  %v2295_v4 = vld [vmem:[#allocation12 + $0x264] ss:$16 sps:$4 sm:$0xff]  }
 0x256   :  { %722 = vmatprep.subr.bf16.mxu0 %v2214_v5  ;;  %v2298_v5 = vld [vmem:[#allocation12 + $0x26c] ss:$16 sps:$4 sm:$0xff]  }
 0x259   :  { %723 = vmatpush1.bf16.msra.mxu0 %v2212_v6  ;;  %v2293_v6 = vld [vmem:[#allocation12 + $0x260] ss:$16 sps:$4 sm:$0xff]  }
 0x25a   :  { %724 = vmatprep.subr.bf16.mxu0 %v2220_v8  ;;  %v2301_v8 = vld [vmem:[#allocation12 + $0x284] ss:$16 sps:$4 sm:$0xff]  }
 0x25d   :  { %725 = vmatpush1.bf16.msra.mxu0 %v2218_v10  ;;  %v2299_v10 = vld [vmem:[#allocation12 + $0x280] ss:$16 sps:$4 sm:$0xff]  }
 0x25e   :  { %726 = vmatprep.subr.bf16.mxu0 %v2226_v12  ;;  %v2307_v12 = vld [vmem:[#allocation12 + $0x2a4] ss:$16 sps:$4 sm:$0xff]  }
 0x261   :  { %727 = vmatpush1.bf16.msra.mxu0 %v2224_v14  ;;  %v2305_v14 = vld [vmem:[#allocation12 + $0x2a0] ss:$16 sps:$4 sm:$0xff]  }
 0x262   :  { %953 = vmatprep.subr.bf16.mxu0 %v2232_v17  ;;  %v2313_v17 = vld [vmem:[#allocation12 + $0x2c4] ss:$16 sps:$4 sm:$0xff]  }
 0x317   :  { %v2134_v19 = vpop.f32.mrb[0].mxu0 }
 0x318   :  { %v2800_v20 = vadd.f32 %v2134_v19, %v1902_v18  ;;  %v432_v21 = vpop.f32.mrb[1].mxu0  ;;  %v2311_v19 = vld [vmem:[#allocation12 + $0x2c0] ss:$16 sps:$4 sm:$0xff]  }
 0x319   :  { %v433_v22 = vadd.f32 %v1902_v18, %v432_v21  ;;  %v2316_v18 = vld [vmem:[#allocation12 + $0x2cc] ss:$16 sps:$4 sm:$0xff]   ;;  %v2314_v21 = vld [vmem:[#allocation12 + $0x2c8] ss:$16 sps:$4 sm:$0xff]  }
 0x31b   :  { %v441_v23 = vmax.f32 %v433_v22, 0.0  ;;  %v2319_v22 = vld [vmem:[#allocation12 + $0x2e4] ss:$16 sps:$4 sm:$0xff]  }
 0x31d   :  { %v2802_v24 = vpack.c.bf16 %v441_v23, %v441_v23  ;;  %v2322_v23 = vld [vmem:[#allocation12 + $0x2ec] ss:$16 sps:$4 sm:$0xff]  }
 0x31f   :  { %v510_v27 = vrot.slane %v2802_v24, 1 }
 0x321   :  { %705 = vmatmul.mubr.bf16.vlgmr.msra.gmra.mrb[4].mxu1 %v510_v27  ;;  %745 = vmatmul.mubr.bf16.vlgmr.msra.gmra.mrb[4].mxu0 %v510_v27  ;;  %v2325_v27 = vld [vmem:[#allocation12 + $0x304] ss:$16 sps:$4 sm:$0xff]  }
 0x322   :  { %914 = vmatpush1.bf16.msra.mxu1 %v2227_v25  ;;  %954 = vmatpush1.bf16.msra.mxu0 %v2230_v26  ;;  %v2317_v25 = vld [vmem:[#allocation12 + $0x2e0] ss:$16 sps:$4 sm:$0xff]   ;;  %v2320_v26 = vld [vmem:[#allocation12 + $0x2e8] ss:$16 sps:$4 sm:$0xff]  }
 0x323   :  { %915 = vmatprep.subr.bf16.mxu1 %v2235_v28  ;;  %955 = vmatprep.subr.bf16.mxu0 %v2238_v29  ;;  %v2328_v28 = vld [vmem:[#allocation12 + $0x30c] ss:$16 sps:$4 sm:$0xff]   ;;  %v2323_v29 = vld [vmem:[#allocation12 + $0x300] ss:$16 sps:$4 sm:$0xff]  }
 0x324   :  { %945 = vmatprep.mubr.bf16.mxu1 %v2604_v16  ;;  %985 = vmatprep.mubr.bf16.mxu0 %v2604_v16 }
 0x326   :  { %916 = vmatpush1.bf16.msra.mxu1 %v2233_v30  ;;  %956 = vmatpush1.bf16.msra.mxu0 %v2236_v31  ;;  %v2326_v30 = vld [vmem:[#allocation12 + $0x308] ss:$16 sps:$4 sm:$0xff]   ;;  %v1027_v31 = vrot.slane %v2802_v24, 2 }
 0x327   :  { %917 = vmatprep.subr.bf16.mxu1 %v2241_v32  ;;  %957 = vmatprep.subr.bf16.mxu0 %v2244_v33  ;;  %v2331_v32 = vld [vmem:[#allocation12 + $0x324] ss:$16 sps:$4 sm:$0xff]   ;;  %v2334_v33 = vld [vmem:[#allocation12 + $0x32c] ss:$16 sps:$4 sm:$0xff]  }
 0x32a   :  { %918 = vmatpush1.bf16.msra.mxu1 %v2239_v34  ;;  %958 = vmatpush1.bf16.msra.mxu0 %v2242_v35  ;;  %v2329_v34 = vld [vmem:[#allocation12 + $0x320] ss:$16 sps:$4 sm:$0xff]   ;;  %v2332_v35 = vld [vmem:[#allocation12 + $0x328] ss:$16 sps:$4 sm:$0xff]  }
 0x32b   :  { %919 = vmatprep.subr.bf16.mxu1 %v2247_v36  ;;  %959 = vmatprep.subr.bf16.mxu0 %v2250_v37  ;;  %v2337_v36 = vld [vmem:[#allocation12 + $0x344] ss:$16 sps:$4 sm:$0xff]   ;;  %v2340_v37 = vld [vmem:[#allocation12 + $0x34c] ss:$16 sps:$4 sm:$0xff]  }
 0x32e   :  { %920 = vmatpush1.bf16.msra.mxu1 %v2245_v38  ;;  %960 = vmatpush1.bf16.msra.mxu0 %v2248_v39  ;;  %v2335_v38 = vld [vmem:[#allocation12 + $0x340] ss:$16 sps:$4 sm:$0xff]   ;;  %v2338_v39 = vld [vmem:[#allocation12 + $0x348] ss:$16 sps:$4 sm:$0xff]  }
 0x32f   :  { %921 = vmatprep.subr.bf16.mxu1 %v2253_v40  ;;  %961 = vmatprep.subr.bf16.mxu0 %v2256_v41  ;;  %v2343_v40 = vld [vmem:[#allocation12 + $0x364] ss:$16 sps:$4 sm:$0xff]   ;;  %v2346_v41 = vld [vmem:[#allocation12 + $0x36c] ss:$16 sps:$4 sm:$0xff]  }
 0x332   :  { %922 = vmatpush1.bf16.msra.mxu1 %v2251_v42  ;;  %962 = vmatpush1.bf16.msra.mxu0 %v2254_v43  ;;  %v2341_v42 = vld [vmem:[#allocation12 + $0x360] ss:$16 sps:$4 sm:$0xff]   ;;  %v2344_v43 = vld [vmem:[#allocation12 + $0x368] ss:$16 sps:$4 sm:$0xff]  }
 0x333   :  { %923 = vmatprep.subr.bf16.mxu1 %v2259_v44  ;;  %963 = vmatprep.subr.bf16.mxu0 %v2262_v45  ;;  %v2349_v44 = vld [vmem:[#allocation12 + $0x384] ss:$16 sps:$4 sm:$0xff]   ;;  %v2352_v45 = vld [vmem:[#allocation12 + $0x38c] ss:$16 sps:$4 sm:$0xff]  }
 0x336   :  { %924 = vmatpush1.bf16.msra.mxu1 %v2257_v46  ;;  %964 = vmatpush1.bf16.msra.mxu0 %v2260_v47  ;;  %v2347_v46 = vld [vmem:[#allocation12 + $0x380] ss:$16 sps:$4 sm:$0xff]   ;;  %v2350_v47 = vld [vmem:[#allocation12 + $0x388] ss:$16 sps:$4 sm:$0xff]  }
 0x337   :  { %925 = vmatprep.subr.bf16.mxu1 %v2265_v48  ;;  %965 = vmatprep.subr.bf16.mxu0 %v2268_v49  ;;  %v2355_v48 = vld [vmem:[#allocation12 + $0x3a4] ss:$16 sps:$4 sm:$0xff]   ;;  %v2358_v49 = vld [vmem:[#allocation12 + $0x3ac] ss:$16 sps:$4 sm:$0xff]  }
 0x33a   :  { %926 = vmatpush1.bf16.msra.mxu1 %v2263_v50  ;;  %966 = vmatpush1.bf16.msra.mxu0 %v2266_v51  ;;  %v2353_v50 = vld [vmem:[#allocation12 + $0x3a0] ss:$16 sps:$4 sm:$0xff]   ;;  %v2356_v51 = vld [vmem:[#allocation12 + $0x3a8] ss:$16 sps:$4 sm:$0xff]  }
 0x33b   :  { %927 = vmatprep.subr.bf16.mxu1 %v2271_v52  ;;  %967 = vmatprep.subr.bf16.mxu0 %v2274_v53  ;;  %v2361_v52 = vld [vmem:[#allocation12 + $0x3c4] ss:$16 sps:$4 sm:$0xff]   ;;  %v2364_v53 = vld [vmem:[#allocation12 + $0x3cc] ss:$16 sps:$4 sm:$0xff]  }
 0x33e   :  { %928 = vmatpush1.bf16.msra.mxu1 %v2269_v54  ;;  %968 = vmatpush1.bf16.msra.mxu0 %v2272_v55  ;;  %v2359_v54 = vld [vmem:[#allocation12 + $0x3c0] ss:$16 sps:$4 sm:$0xff]   ;;  %v2362_v55 = vld [vmem:[#allocation12 + $0x3c8] ss:$16 sps:$4 sm:$0xff]  }
 0x33f   :  { %1189 = vmatprep.subr.bf16.mxu1 %v2277_v56  ;;  %1229 = vmatprep.subr.bf16.mxu0 %v2280_v57  ;;  %v2367_v56 = vld [vmem:[#allocation12 + $0x3e4] ss:$16 sps:$4 sm:$0xff]   ;;  %v2370_v57 = vld [vmem:[#allocation12 + $0x3ec] ss:$16 sps:$4 sm:$0xff]  }
 0x341   :  { %946 = vmatmul.mubr.bf16.vlgmr.msra.gmra.mrb[8].mxu1 %v2802_v24  ;;  %986 = vmatmul.mubr.bf16.vlgmr.msra.gmra.mrb[8].mxu0 %v2802_v24 }
 0x342   :  { %1190 = vmatpush1.bf16.msra.mxu1 %v2275_v58  ;;  %1230 = vmatpush1.bf16.msra.mxu0 %v2278_v59  ;;  %v2365_v58 = vld [vmem:[#allocation12 + $0x3e0] ss:$16 sps:$4 sm:$0xff]   ;;  %v2368_v59 = vld [vmem:[#allocation12 + $0x3e8] ss:$16 sps:$4 sm:$0xff]  }
 0x343   :  { %1191 = vmatprep.subr.bf16.mxu1 %v2283_v60  ;;  %1231 = vmatprep.subr.bf16.mxu0 %v2286_v61  ;;  %v2373_v60 = vld [vmem:[#allocation12 + $0x404] ss:$16 sps:$4 sm:$0xff]   ;;  %v2376_v61 = vld [vmem:[#allocation12 + $0x40c] ss:$16 sps:$4 sm:$0xff]  }
 0x344   :  { %1221 = vmatprep.mubr.bf16.mxu1 %v2604_v16  ;;  %1261 = vmatprep.mubr.bf16.mxu0 %v2604_v16 }
 0x346   :  { %1192 = vmatpush1.bf16.msra.mxu1 %v2281_v62  ;;  %1232 = vmatpush1.bf16.msra.mxu0 %v2284_v63  ;;  %v2371_v62 = vld [vmem:[#allocation12 + $0x400] ss:$16 sps:$4 sm:$0xff]   ;;  %v2374_v63 = vld [vmem:[#allocation12 + $0x408] ss:$16 sps:$4 sm:$0xff]  }
 0x347   :  { %1193 = vmatprep.subr.bf16.mxu1 %v2289_v0  ;;  %1233 = vmatprep.subr.bf16.mxu0 %v2292_v1  ;;  %v1306_v0 = vrot.slane %v2802_v24, 3  ;;  %v2379_v1 = vld [vmem:[#allocation12 + $0x424] ss:$16 sps:$4 sm:$0xff]   ;;  %v2383_v24 = vld [vmem:[#allocation12 + $0x440] ss:$16 sps:$4 sm:$0xff]  }
 0x34a   :  { %1194 = vmatpush1.bf16.msra.mxu1 %v2287_v2  ;;  %1234 = vmatpush1.bf16.msra.mxu0 %v2290_v3  ;;  %v2382_v2 = vld [vmem:[#allocation12 + $0x42c] ss:$16 sps:$4 sm:$0xff]   ;;  %v2377_v3 = vld [vmem:[#allocation12 + $0x420] ss:$16 sps:$4 sm:$0xff]  }
 0x34b   :  { %1195 = vmatprep.subr.bf16.mxu1 %v2295_v4  ;;  %1235 = vmatprep.subr.bf16.mxu0 %v2298_v5  ;;  %v2380_v4 = vld [vmem:[#allocation12 + $0x428] ss:$16 sps:$4 sm:$0xff]   ;;  %v2385_v5 = vld [vmem:[#allocation12 + $0x444] ss:$16 sps:$4 sm:$0xff]  }
 0x34e   :  { %1196 = vmatpush1.bf16.msra.mxu1 %v2293_v6  ;;  %1236 = vmatpush1.bf16.msra.mxu0 %v2296_v7  ;;  %v2388_v6 = vld [vmem:[#allocation12 + $0x44c] ss:$16 sps:$4 sm:$0xff]   ;;  %v2386_v7 = vld [vmem:[#allocation12 + $0x448] ss:$16 sps:$4 sm:$0xff]  }
 0x34f   :  { %1197 = vmatprep.subr.bf16.mxu1 %v2301_v8  ;;  %1237 = vmatprep.subr.bf16.mxu0 %v2304_v9  ;;  %v2391_v8 = vld [vmem:[#allocation12 + $0x464] ss:$16 sps:$4 sm:$0xff]   ;;  %v2394_v9 = vld [vmem:[#allocation12 + $0x46c] ss:$16 sps:$4 sm:$0xff]  }
 0x352   :  { %1198 = vmatpush1.bf16.msra.mxu1 %v2299_v10  ;;  %1238 = vmatpush1.bf16.msra.mxu0 %v2302_v11  ;;  %v2389_v10 = vld [vmem:[#allocation12 + $0x460] ss:$16 sps:$4 sm:$0xff]   ;;  %v2392_v11 = vld [vmem:[#allocation12 + $0x468] ss:$16 sps:$4 sm:$0xff]  }
 0x353   :  { %1199 = vmatprep.subr.bf16.mxu1 %v2307_v12  ;;  %1239 = vmatprep.subr.bf16.mxu0 %v2310_v13  ;;  %v2397_v12 = vld [vmem:[#allocation12 + $0x484] ss:$16 sps:$4 sm:$0xff]   ;;  %v2400_v13 = vld [vmem:[#allocation12 + $0x48c] ss:$16 sps:$4 sm:$0xff]  }
 0x356   :  { %1200 = vmatpush1.bf16.msra.mxu1 %v2305_v14  ;;  %1240 = vmatpush1.bf16.msra.mxu0 %v2308_v15  ;;  %v2395_v14 = vld [vmem:[#allocation12 + $0x480] ss:$16 sps:$4 sm:$0xff]   ;;  %v2403_v15 = vld [vmem:[#allocation12 + $0x4a4] ss:$16 sps:$4 sm:$0xff]  }
 0x357   :  { %1201 = vmatprep.subr.bf16.mxu1 %v2313_v17  ;;  %1241 = vmatprep.subr.bf16.mxu0 %v2316_v18  ;;  %v2406_v17 = vld [vmem:[#allocation12 + $0x4ac] ss:$16 sps:$4 sm:$0xff]   ;;  %v2401_v18 = vld [vmem:[#allocation12 + $0x4a0] ss:$16 sps:$4 sm:$0xff]  }
 0x35a   :  { %1202 = vmatpush1.bf16.msra.mxu1 %v2311_v19  ;;  %1242 = vmatpush1.bf16.msra.mxu0 %v2314_v21  ;;  %v2404_v19 = vld [vmem:[#allocation12 + $0x4a8] ss:$16 sps:$4 sm:$0xff]   ;;  %v2409_v21 = vld [vmem:[#allocation12 + $0x4c4] ss:$16 sps:$4 sm:$0xff]  }
 0x35b   :  { %1203 = vmatprep.subr.bf16.mxu1 %v2319_v22  ;;  %1243 = vmatprep.subr.bf16.mxu0 %v2322_v23  ;;  %v2412_v22 = vld [vmem:[#allocation12 + $0x4cc] ss:$16 sps:$4 sm:$0xff]   ;;  %v2407_v23 = vld [vmem:[#allocation12 + $0x4c0] ss:$16 sps:$4 sm:$0xff]  }
 0x35e   :  { %1204 = vmatpush1.bf16.msra.mxu1 %v2317_v25  ;;  %1244 = vmatpush1.bf16.msra.mxu0 %v2320_v26  ;;  %v2410_v25 = vld [vmem:[#allocation12 + $0x4c8] ss:$16 sps:$4 sm:$0xff]   ;;  %v2415_v26 = vld [vmem:[#allocation12 + $0x4e4] ss:$16 sps:$4 sm:$0xff]  }
 0x35f   :  { %1468 = vmatprep.subr.bf16.mxu1 %v2325_v27  ;;  %1508 = vmatprep.subr.bf16.mxu0 %v2328_v28  ;;  %v2418_v27 = vld [vmem:[#allocation12 + $0x4ec] ss:$16 sps:$4 sm:$0xff]   ;;  %v2413_v28 = vld [vmem:[#allocation12 + $0x4e0] ss:$16 sps:$4 sm:$0xff]  }
 0x361   :  { %1222 = vmatmul.mubr.bf16.vlgmr.msra.gmra.mrb[12].mxu1 %v1027_v31  ;;  %1262 = vmatmul.mubr.bf16.vlgmr.msra.gmra.mrb[12].mxu0 %v1027_v31 }
 0x362   :  { %1469 = vmatpush1.bf16.msra.mxu1 %v2323_v29  ;;  %1509 = vmatpush1.bf16.msra.mxu0 %v2326_v30  ;;  %v2416_v29 = vld [vmem:[#allocation12 + $0x4e8] ss:$16 sps:$4 sm:$0xff]   ;;  %v442_v30 = vmax.f32 %v2800_v20, 0.0 }
 0x363   :  { %1470 = vmatprep.subr.bf16.mxu1 %v2331_v32  ;;  %1510 = vmatprep.subr.bf16.mxu0 %v2334_v33 }
 0x364   :  { %1500 = vmatprep.mubr.bf16.mxu1 %v2604_v16  ;;  %1540 = vmatprep.mubr.bf16.mxu0 %v2604_v16  ;;  %v1552_v31 = vpack.c.bf16 %v442_v30, %v442_v30 }
 0x366   :  { %1471 = vmatpush1.bf16.msra.mxu1 %v2329_v34  ;;  %1511 = vmatpush1.bf16.msra.mxu0 %v2332_v35 }
 0x367   :  { %1472 = vmatprep.subr.bf16.mxu1 %v2337_v36  ;;  %1512 = vmatprep.subr.bf16.mxu0 %v2340_v37 }
 0x36a   :  { %1473 = vmatpush1.bf16.msra.mxu1 %v2335_v38  ;;  %1513 = vmatpush1.bf16.msra.mxu0 %v2338_v39 }
 0x36b   :  { %1474 = vmatprep.subr.bf16.mxu1 %v2343_v40  ;;  %1514 = vmatprep.subr.bf16.mxu0 %v2346_v41 }
 0x36e   :  { %1475 = vmatpush1.bf16.msra.mxu1 %v2341_v42  ;;  %1515 = vmatpush1.bf16.msra.mxu0 %v2344_v43 }
 0x36f   :  { %1476 = vmatprep.subr.bf16.mxu1 %v2349_v44  ;;  %1516 = vmatprep.subr.bf16.mxu0 %v2352_v45 }
 0x372   :  { %1477 = vmatpush1.bf16.msra.mxu1 %v2347_v46  ;;  %1517 = vmatpush1.bf16.msra.mxu0 %v2350_v47 }
 0x373   :  { %1478 = vmatprep.subr.bf16.mxu1 %v2355_v48  ;;  %1518 = vmatprep.subr.bf16.mxu0 %v2358_v49 }
 0x376   :  { %1479 = vmatpush1.bf16.msra.mxu1 %v2353_v50  ;;  %1519 = vmatpush1.bf16.msra.mxu0 %v2356_v51 }
 0x377   :  { %1480 = vmatprep.subr.bf16.mxu1 %v2361_v52  ;;  %1520 = vmatprep.subr.bf16.mxu0 %v2364_v53 }
 0x37a   :  { %1481 = vmatpush1.bf16.msra.mxu1 %v2359_v54  ;;  %1521 = vmatpush1.bf16.msra.mxu0 %v2362_v55 }
 0x37b   :  { %1482 = vmatprep.subr.bf16.mxu1 %v2367_v56  ;;  %1522 = vmatprep.subr.bf16.mxu0 %v2370_v57 }
 0x37e   :  { %1483 = vmatpush1.bf16.msra.mxu1 %v2365_v58  ;;  %1523 = vmatpush1.bf16.msra.mxu0 %v2368_v59 }
 0x37f   :  { %1746 = vmatprep.subr.bf16.mxu1 %v2373_v60  ;;  %1786 = vmatprep.subr.bf16.mxu0 %v2376_v61 }
 0x381   :  { %1501 = vmatmul.mubr.bf16.vlgmr.msra.gmra.mrb[16].mxu1 %v1306_v0  ;;  %1541 = vmatmul.mubr.bf16.vlgmr.msra.gmra.mrb[16].mxu0 %v1306_v0 }
 0x382   :  { %1747 = vmatpush1.bf16.msra.mxu1 %v2371_v62  ;;  %1787 = vmatpush1.bf16.msra.mxu0 %v2374_v63 }
 0x383   :  { %1748 = vmatprep.subr.bf16.mxu1 %v2379_v1  ;;  %1788 = vmatprep.subr.bf16.mxu0 %v2382_v2 }
 0x384   :  { %1778 = vmatprep.mubr.bf16.mxu1 %v2604_v16  ;;  %1818 = vmatprep.mubr.bf16.mxu0 %v2604_v16  ;;  %v2398_v16 = vld [vmem:[#allocation12 + $0x488] ss:$16 sps:$4 sm:$0xff]  }
 0x386   :  { %1749 = vmatpush1.bf16.msra.mxu1 %v2377_v3  ;;  %1789 = vmatpush1.bf16.msra.mxu0 %v2380_v4 }
 0x387   :  { %1750 = vmatprep.subr.bf16.mxu1 %v2385_v5  ;;  %1790 = vmatprep.subr.bf16.mxu0 %v2388_v6 }
 0x38a   :  { %1751 = vmatpush1.bf16.msra.mxu1 %v2383_v24  ;;  %1791 = vmatpush1.bf16.msra.mxu0 %v2386_v7  ;;  %v1832_v7 = vlaneseq }
 0x38b   :  { %1752 = vmatprep.subr.bf16.mxu1 %v2391_v8  ;;  %1792 = vmatprep.subr.bf16.mxu0 %v2394_v9 }
 0x38c   :  { %v1833_v8 = vshrl.u32 %v1832_v7, 7 }
 0x38e   :  { %1753 = vmatpush1.bf16.msra.mxu1 %v2389_v10  ;;  %1793 = vmatpush1.bf16.msra.mxu0 %v2392_v11  ;;  %v1834_v9 = vsub.s32 0, %v1833_v8  ;;  %v1830_v10 = vld [vmem:[#allocation14] sm:$0xf] }
 0x38f   :  { %1754 = vmatprep.subr.bf16.mxu1 %v2397_v12  ;;  %1794 = vmatprep.subr.bf16.mxu0 %v2400_v13  ;;  %v1842_v12 = vsub.s32 3, %v1833_v8 }
 0x390   :  { %v1835_v11 = vrot.slane %v1830_v10, %v1834_v9 }
 0x392   :  { %1755 = vmatpush1.bf16.msra.mxu1 %v2395_v14  ;;  %1795 = vmatpush1.bf16.msra.mxu0 %v2398_v16 }
 0x393   :  { %1756 = vmatprep.subr.bf16.mxu1 %v2403_v15  ;;  %1796 = vmatprep.subr.bf16.mxu0 %v2406_v17 }
 0x396   :  { %1757 = vmatpush1.bf16.msra.mxu1 %v2401_v18  ;;  %1797 = vmatpush1.bf16.msra.mxu0 %v2404_v19 }
 0x397   :  { %1758 = vmatprep.subr.bf16.mxu1 %v2409_v21  ;;  %1798 = vmatprep.subr.bf16.mxu0 %v2412_v22 }
 0x39a   :  { %1759 = vmatpush1.bf16.msra.mxu1 %v2407_v23  ;;  %1799 = vmatpush1.bf16.msra.mxu0 %v2410_v25  ;;  %v1843_v25 = vrot.slane %v1830_v10, %v1842_v12 }
 0x39b   :  { %1760 = vmatprep.subr.bf16.mxu1 %v2415_v26  ;;  %1800 = vmatprep.subr.bf16.mxu0 %v2418_v27 }
 0x39e   :  { %1761 = vmatpush1.bf16.msra.mxu1 %v2413_v28  ;;  %1801 = vmatpush1.bf16.msra.mxu0 %v2416_v29  ;;  %v1838_v29 = vsub.s32 2, %v1833_v8 }
 0x3a1   :  { %1779 = vmatmul.mubr.bf16.vlgmr.msra.gmra.mrb[20].mxu1 %v1552_v31  ;;  %1819 = vmatmul.mubr.bf16.vlgmr.msra.gmra.mrb[20].mxu0 %v1552_v31  ;;  %v1839_v31 = vrot.slane %v1830_v10, %v1838_v29 }
 0x3f4   :  { %v706_v32 = vpop.f32.mrb[4].mxu1  ;;  %v746_v33 = vpop.f32.mrb[4].mxu0 }
 0x3f5   :  { %v708_v34 = vpop.f32.mrb[5].mxu1  ;;  %v748_v35 = vpop.f32.mrb[5].mxu0 }
 0x3f6   :  { %v709_v36 = vpop.f32.mrb[6].mxu1  ;;  %v750_v37 = vpop.f32.mrb[6].mxu0 }
 0x3f7   :  { %v710_v38 = vpop.f32.mrb[7].mxu1  ;;  %v751_v39 = vpop.f32.mrb[7].mxu0 }
 0x414   :  { %v947_v40 = vpop.f32.mrb[8].mxu1  ;;  %v987_v41 = vpop.f32.mrb[8].mxu0 }
 0x415   :  { %v948_v42 = vadd.f32 %v947_v40, %v706_v32  ;;  %v988_v43 = vadd.f32 %v987_v41, %v746_v33  ;;  %v949_v20 = vpop.f32.mrb[9].mxu1  ;;  %v989_v44 = vpop.f32.mrb[9].mxu0 }
 0x416   :  { %v990_v45 = vadd.f32 %v989_v44, %v748_v35  ;;  %v950_v46 = vpop.f32.mrb[10].mxu1  ;;  %v991_v47 = vpop.f32.mrb[10].mxu0 }
 0x417   :  { %v951_v48 = vpop.f32.mrb[11].mxu1  ;;  %v992_v49 = vpop.f32.mrb[11].mxu0  ;;  %v2068_v46 = vld [vmem:[#allocation3] ss:$0 sm:$0xff] }
 0x434   :  { %v1223_v50 = vpop.f32.mrb[12].mxu1  ;;  %v1263_v51 = vpop.f32.mrb[12].mxu0 }
 0x435   :  { %v1270_v52 = vadd.f32 %v1223_v50, %v948_v42  ;;  %v1271_v53 = vadd.f32 %v1263_v51, %v988_v43  ;;  %v1225_v54 = vpop.f32.mrb[13].mxu1  ;;  %v1265_v55 = vpop.f32.mrb[13].mxu0  ;;  %v2067_v43 = vld [vmem:[%s2837_s13] ss:$0 sm:$0xff] }
 0x436   :  { %v1272_v56 = vadd.f32 %v1265_v55, %v990_v45  ;;  %v1226_v57 = vpop.f32.mrb[14].mxu1  ;;  %v1267_v58 = vpop.f32.mrb[14].mxu0 }
 0x437   :  { %v1227_v59 = vpop.f32.mrb[15].mxu1  ;;  %v1268_v60 = vpop.f32.mrb[15].mxu0 }
 0x454   :  { %v1502_v61 = vpop.f32.mrb[16].mxu1  ;;  %v1542_v62 = vpop.f32.mrb[16].mxu0 }
 0x455   :  { %v1549_v63 = vadd.f32 %v1502_v61, %v1270_v52  ;;  %v1550_v0 = vadd.f32 %v1542_v62, %v1271_v53  ;;  %v1504_v1 = vpop.f32.mrb[17].mxu1  ;;  %v1544_v2 = vpop.f32.mrb[17].mxu0 }
 0x456   :  { %v1551_v3 = vadd.f32 %v1544_v2, %v1272_v56  ;;  %v1505_v4 = vpop.f32.mrb[18].mxu1  ;;  %v1546_v5 = vpop.f32.mrb[18].mxu0 }
 0x457   :  { %v1506_v6 = vpop.f32.mrb[19].mxu1  ;;  %v1547_v24 = vpop.f32.mrb[19].mxu0 }
 0x474   :  { %v1780_v13 = vpop.f32.mrb[20].mxu1  ;;  %v1820_v14 = vpop.f32.mrb[20].mxu0 }
 0x475   :  { %v1827_v16 = vadd.f32 %v1780_v13, %v1549_v63  ;;  %v1828_v15 = vadd.f32 %v1820_v14, %v1550_v0  ;;  %v1782_v17 = vpop.f32.mrb[21].mxu1  ;;  %v1822_v18 = vpop.f32.mrb[21].mxu0 }
 0x476   :  { %v1829_v19 = vadd.f32 %v1822_v18, %v1551_v3  ;;  %v1783_v21 = vpop.f32.mrb[22].mxu1  ;;  %v1824_v22 = vpop.f32.mrb[22].mxu0 }
 0x477   :  { %v1847_v23 = vadd.f32 %v1835_v11, %v1827_v16  ;;  %v1784_v26 = vpop.f32.mrb[23].mxu1  ;;  %v1825_v27 = vpop.f32.mrb[23].mxu0  ;;  %v1848_v33 = vadd.f32 %v1839_v31, %v1828_v15 }
 0x478   :  { %v1849_v30 = vadd.f32 %v1843_v25, %v1829_v19 }
 0x479   :  { %v2065_v28 = vmul.f32 -1.442695, %v1847_v23 }
 0x47a   :  { %v2066_v32 = vmul.f32 -1.442695, %v1849_v30 }
 0x47b   :  { %2419 = vpow2.f32 %v2065_v28 }
 0x47c   :  { %2421 = vpow2.f32 %v2066_v32 }
 0x47d   :  { %2423 = vtanh.f32 %v1848_v33 }
 0x485   :  { %v2420_v34 = vpop.eup %2419 }
 0x486   :  { %v1853_v35 = vadd.f32 1.0, %v2420_v34  ;;  %v2422_v36 = vpop.eup %2421 }
 0x487   :  { %v1860_v37 = vadd.f32 1.0, %v2422_v36  ;;  %v2424_v38 = vpop.eup %2423 }
 0x488   :  { %2425 = vrcp.f32 %v1853_v35 }
 0x489   :  { %2427 = vrcp.f32 %v1860_v37 }
 0x492   :  { %v2426_v39 = vpop.eup %2425 }
 0x493   :  { %v1863_v40 = vmul.f32 %v2426_v39, %v2424_v38  ;;  %v2428_v41 = vpop.eup %2427 }
 0x495   :  { %2429 = vtanh.f32 %v1863_v40 }
 0x49f   :  { %v2430_v42 = vpop.eup %2429 }
 0x4a0   :  { %v1865_v20 = vmul.f32 %v2430_v42, %v2428_v41 }
 0x4a2   :  { %v1873_v44 = vmul.f32 %v2067_v43, %v1865_v20 }
 0x4a4   :  { %v1875_v45 = vsel %vm1874_vm4, %v1873_v44, 0.0 }
 0x4a5   :  { %1876 = vadd.xlane.f32.xlu0 %v1875_v45 }
 0x532   :  { %v1877_v47 = vpop.xlane.xlu0 %1876 }
 0x533   :  { %v1885_v48 = vadd.f32 %v2068_v46, %v1877_v47 }
 0x535   :  { %1887 = vst.msk [vmem:[%s2839_s15] sm:$0x3] %vm1886_vm5, %v1885_v48 }
 0x536   :  { %1892 = vsyncpa [#allocation5], 1 }
 0x537   :  { %1893 = vsyncpa [#allocation7], 1 }
 0x538   :  { %1894 = vsyncpa [#allocation10], 1 }
 0x539   :  { %1895 = vsyncpa [#allocation13], 1 }

</bundles_post_ra>
